<compile_context>
chip_gen: v7x
topology: tpu7x:2x2x1
jax: 0.10.0
libtpu: 0.0.40
codegen_flags: <defaults>
</compile_context>

<pallas_src>
import jax
import jax.numpy as jnp
from jax.experimental import pallas as pl
from jax.experimental.pallas import tpu as pltpu


def _make_mlp_q_kernel(n_parts, compute_dtype):
    """Kernel factory: n_parts = number of input components (obs[, goal], act)."""

    def kernel(*refs):
        x_refs = refs[:n_parts]                      # each [d_i, block_m]
        w1_refs = refs[n_parts:2 * n_parts]          # each [H1, d_i]
        b1_ref, w2_ref, b2_ref, w3_ref, b3_ref, out_ref = refs[2 * n_parts:]
        cd = compute_dtype

        # Layer 1: fused concat -> sum of partial matmuls, + bias, ReLU.
        h = jnp.dot(w1_refs[0][...].astype(cd), x_refs[0][...].astype(cd),
                    preferred_element_type=jnp.float32)
        for xr, wr in zip(x_refs[1:], w1_refs[1:]):
            h = h + jnp.dot(wr[...].astype(cd), xr[...].astype(cd),
                            preferred_element_type=jnp.float32)
        h = jnp.maximum(h + b1_ref[...], 0.0)        # [H1, block_m]

        # Layer 2: Linear + ReLU.
        h = jnp.dot(w2_ref[...].astype(cd), h.astype(cd),
                    preferred_element_type=jnp.float32)
        h = jnp.maximum(h + b2_ref[...], 0.0)        # [H2, block_m]

        # Layer 3 (out_features = 1): VPU multiply + sublane reduction instead
        # of an N=1 MXU pass.  w3 is passed as a [H2, 1] column.
        q = jnp.sum(h * w3_ref[...], axis=0, keepdims=True) + b3_ref[...]
        out_ref[...] = q.astype(out_ref.dtype)       # lane-dense [1, block_m]

    return kernel


def mlp_general_q_forward(params, obs, act, goal=None, *,
                          block_m=512, compute_dtype=jnp.float32):
    """Pallas implementation of MLP_GeneralQFunction.forward.

    params: dict with w1/b1/w2/b2/w3/b3; weights in PyTorch [out, in] layout,
            biases as [out, 1] columns.
    obs:  [B, obs_dim]
    act:  [B, act_dim]
    goal: [B, goal_dim] or None (goal_dim = 0)
    returns: [B] q-values.
    """
    obs = jnp.asarray(obs)
    act = jnp.asarray(act)

    # Concat order of the module is [obs, goal, act]; drop empty components.
    parts = [obs]
    if goal is not None and goal.shape[-1] > 0:
        parts.append(jnp.asarray(goal))
    parts.append(act)
    dims = [int(p.shape[-1]) for p in parts]

    w1, b1 = params["w1"], params["b1"]
    w2, b2 = params["w2"], params["b2"]
    w3, b3 = params["w3"], params["b3"]
    H1, D = w1.shape
    H2 = w2.shape[0]
    assert D == sum(dims), (D, dims)

    # Split w1 per input component (fuses the concat into the kernel).
    offs, w1_parts = 0, []
    for d in dims:
        w1_parts.append(w1[:, offs:offs + d])
        offs += d
    w3_col = jnp.reshape(w3, (H2, 1))                # [1, H2] -> [H2, 1]

    B = obs.shape[0]
    # Batch tiling: one step for small batches; 128-aligned tiles + padding
    # otherwise (no B % block_m assert).
    if B <= block_m:
        bm, B_pad = B, B
    else:
        bm = block_m                                 # multiple of 128
        B_pad = ((B + bm - 1) // bm) * bm
    grid = (B_pad // bm,)

    # Batch-on-lanes: transpose each input to [feature, batch], pad batch.
    xs = []
    for p in parts:
        x_t = jnp.transpose(p)                       # [d_i, B]
        if B_pad != B:
            x_t = jnp.pad(x_t, ((0, 0), (0, B_pad - B)))
        xs.append(x_t)

    in_specs = (
        [pl.BlockSpec((d, bm), lambda i: (0, i)) for d in dims] +       # x tiles
        [pl.BlockSpec((H1, d), lambda i: (0, 0)) for d in dims] +       # w1 parts
        [pl.BlockSpec((H1, 1), lambda i: (0, 0)),                       # b1
         pl.BlockSpec((H2, H1), lambda i: (0, 0)),                      # w2
         pl.BlockSpec((H2, 1), lambda i: (0, 0)),                       # b2
         pl.BlockSpec((H2, 1), lambda i: (0, 0)),                       # w3 (column)
         pl.BlockSpec((1, 1), lambda i: (0, 0))]                        # b3
    )

    kernel = _make_mlp_q_kernel(len(dims), compute_dtype)
    q_t = pl.pallas_call(
        kernel,
        out_shape=jax.ShapeDtypeStruct((1, B_pad), jnp.float32),
        grid_spec=pltpu.PrefetchScalarGridSpec(
            num_scalar_prefetch=0,
            grid=grid,
            in_specs=in_specs,
            out_specs=pl.BlockSpec((1, bm), lambda i: (0, i)),
        ),
        compiler_params=pltpu.CompilerParams(
            dimension_semantics=("parallel",)),
    )(*xs, *w1_parts, b1, w2, b2, w3_col, b3)

    return q_t[0, :B]                                # torch.squeeze(q, -1)


def init_params(key, in_dim, hidden_sizes):
    """nn.Linear-style init (uniform +/- 1/sqrt(fan_in)).
    Weights in PyTorch [out_features, in_features] layout; biases [out, 1]."""
    sizes = [in_dim] + list(hidden_sizes) + [1]
    params = {}
    for j in range(len(sizes) - 1):
        fan_in, fan_out = sizes[j], sizes[j + 1]
        key, kw, kb = jax.random.split(key, 3)
        bound = 1.0 / (float(fan_in) ** 0.5)
        params[f"w{j+1}"] = jax.random.uniform(
            kw, (fan_out, fan_in), jnp.float32, -bound, bound)
        params[f"b{j+1}"] = jax.random.uniform(
            kb, (fan_out, 1), jnp.float32, -bound, bound)
    return params


def reference_forward(params, obs, act, goal=None):
    """Pure-JAX reference for correctness check."""
    if goal is None:
        goal = jnp.zeros(obs.shape[:-1] + (0,), obs.dtype)
    x = jnp.concatenate([obs, goal, act], axis=-1)
    h = jnp.maximum(x @ params["w1"].T + params["b1"][:, 0], 0.0)
    h = jnp.maximum(h @ params["w2"].T + params["b2"][:, 0], 0.0)
    q = h @ params["w3"].T + params["b3"][:, 0]
    return jnp.squeeze(q, -1)


if __name__ == "__main__":
    # Small shapes consistent with the module:
    #   obs_dim=8, goal_dim=4, act_dim=4 -> in_dim=16, hidden_sizes=(32, 32)
    B, obs_dim, goal_dim, act_dim = 8, 8, 4, 4
    hidden_sizes = (32, 32)

    key = jax.random.PRNGKey(0)
    k_obs, k_goal, k_act, k_params, k_rest = jax.random.split(key, 5)

    obs = jax.random.normal(k_obs, (B, obs_dim), jnp.float32)
    goal = jax.random.normal(k_goal, (B, goal_dim), jnp.float32)
    act = jax.random.normal(k_act, (B, act_dim), jnp.float32)
    params = init_params(k_params, obs_dim + goal_dim + act_dim, hidden_sizes)

    # Case 1: tiny batch -> whole batch in a single grid step.
    q = mlp_general_q_forward(params, obs, act, goal)
    q = jax.block_until_ready(q)
    q_ref = reference_forward(params, obs, act, goal)
    assert q.shape == (B,), q.shape
    assert jnp.allclose(q, q_ref, atol=1e-4, rtol=1e-4), (q, q_ref)

    # Case 2: goal=None, ragged batch -> multi-step parallel grid + padding.
    B2 = 300
    k_o2, k_a2, k_p2 = jax.random.split(k_rest, 3)
    obs2 = jax.random.normal(k_o2, (B2, obs_dim), jnp.float32)
    act2 = jax.random.normal(k_a2, (B2, act_dim), jnp.float32)
    params2 = init_params(k_p2, obs_dim + act_dim, hidden_sizes)
    q2 = mlp_general_q_forward(params2, obs2, act2, None, block_m=128)
    q2 = jax.block_until_ready(q2)
    q2_ref = reference_forward(params2, obs2, act2, None)
    assert q2.shape == (B2,), q2.shape
    assert jnp.allclose(q2, q2_ref, atol=1e-4, rtol=1e-4), (q2, q2_ref)

    print("KERNEL_OK")
</pallas_src>

<mosaic_0001>
module attributes {stable_mosaic.version = 11 : i64} {
  func.func @kernel(%arg0: i32, %arg1: memref<8x8xf32, #tpu.memory_space<vmem>>, %arg2: memref<4x8xf32, #tpu.memory_space<vmem>>, %arg3: memref<4x8xf32, #tpu.memory_space<vmem>>, %arg4: memref<32x8xf32, #tpu.memory_space<vmem>>, %arg5: memref<32x4xf32, #tpu.memory_space<vmem>>, %arg6: memref<32x4xf32, #tpu.memory_space<vmem>>, %arg7: memref<32x1xf32, #tpu.memory_space<vmem>>, %arg8: memref<32x32xf32, #tpu.memory_space<vmem>>, %arg9: memref<32x1xf32, #tpu.memory_space<vmem>>, %arg10: memref<32x1xf32, #tpu.memory_space<vmem>>, %arg11: memref<1x1xf32, #tpu.memory_space<vmem>>, %arg12: memref<1x8xf32, #tpu.memory_space<vmem>>) attributes {dimension_semantics = [#tpu.dimension_semantics<parallel>], iteration_bounds = array<i64: 1>, scalar_prefetch = 0 : i64, scratch_operands = 0 : i64, tpu.core_type = #tpu.core_type<tc>, window_params = [{transform_indices = @transform_0, window_bounds = array<i64: 8, 8>}, {transform_indices = @transform_1, window_bounds = array<i64: 4, 8>}, {transform_indices = @transform_2, window_bounds = array<i64: 4, 8>}, {pipeline_mode = #tpu.pipeline_mode<synchronous>, transform_indices = @transform_3, window_bounds = array<i64: 32, 8>}, {pipeline_mode = #tpu.pipeline_mode<synchronous>, transform_indices = @transform_4, window_bounds = array<i64: 32, 4>}, {pipeline_mode = #tpu.pipeline_mode<synchronous>, transform_indices = @transform_5, window_bounds = array<i64: 32, 4>}, {pipeline_mode = #tpu.pipeline_mode<synchronous>, transform_indices = @transform_6, window_bounds = array<i64: 32, 1>}, {pipeline_mode = #tpu.pipeline_mode<synchronous>, transform_indices = @transform_7, window_bounds = array<i64: 32, 32>}, {pipeline_mode = #tpu.pipeline_mode<synchronous>, transform_indices = @transform_8, window_bounds = array<i64: 32, 1>}, {pipeline_mode = #tpu.pipeline_mode<synchronous>, transform_indices = @transform_9, window_bounds = array<i64: 32, 1>}, {pipeline_mode = #tpu.pipeline_mode<synchronous>, transform_indices = @transform_10, window_bounds = array<i64: 1, 1>}, {transform_indices = @transform_11, window_bounds = array<i64: 1, 8>}]} {
    %c0 = arith.constant 0 : index
    %c0_0 = arith.constant 0 : index
    %0 = vector.load %arg4[%c0, %c0_0] : memref<32x8xf32, #tpu.memory_space<vmem>>, vector<32x8xf32>
    %c0_1 = arith.constant 0 : index
    %c0_2 = arith.constant 0 : index
    %1 = vector.load %arg1[%c0_1, %c0_2] : memref<8x8xf32, #tpu.memory_space<vmem>>, vector<8x8xf32>
    %cst = arith.constant dense<0.000000e+00> : vector<32x8xf32>
    %2 = tpu.matmul %0, %1, %cst {dimension_numbers = #tpu.dot_dimension_numbers<[1], [0], [0], [1], [0, 0, 1, 1], [], []>} : vector<32x8xf32>, vector<8x8xf32>, vector<32x8xf32> -> vector<32x8xf32>
    %c0_3 = arith.constant 0 : index
    %c0_4 = arith.constant 0 : index
    %3 = vector.load %arg5[%c0_3, %c0_4] : memref<32x4xf32, #tpu.memory_space<vmem>>, vector<32x4xf32>
    %c0_5 = arith.constant 0 : index
    %c0_6 = arith.constant 0 : index
    %4 = vector.load %arg2[%c0_5, %c0_6] : memref<4x8xf32, #tpu.memory_space<vmem>>, vector<4x8xf32>
    %cst_7 = arith.constant dense<0.000000e+00> : vector<32x8xf32>
    %5 = tpu.matmul %3, %4, %cst_7 {dimension_numbers = #tpu.dot_dimension_numbers<[1], [0], [0], [1], [0, 0, 1, 1], [], []>} : vector<32x4xf32>, vector<4x8xf32>, vector<32x8xf32> -> vector<32x8xf32>
    %6 = arith.addf %2, %5 : vector<32x8xf32>
    %c0_8 = arith.constant 0 : index
    %c0_9 = arith.constant 0 : index
    %7 = vector.load %arg6[%c0_8, %c0_9] : memref<32x4xf32, #tpu.memory_space<vmem>>, vector<32x4xf32>
    %c0_10 = arith.constant 0 : index
    %c0_11 = arith.constant 0 : index
    %8 = vector.load %arg3[%c0_10, %c0_11] : memref<4x8xf32, #tpu.memory_space<vmem>>, vector<4x8xf32>
    %cst_12 = arith.constant dense<0.000000e+00> : vector<32x8xf32>
    %9 = tpu.matmul %7, %8, %cst_12 {dimension_numbers = #tpu.dot_dimension_numbers<[1], [0], [0], [1], [0, 0, 1, 1], [], []>} : vector<32x4xf32>, vector<4x8xf32>, vector<32x8xf32> -> vector<32x8xf32>
    %10 = arith.addf %6, %9 : vector<32x8xf32>
    %c0_13 = arith.constant 0 : index
    %c0_14 = arith.constant 0 : index
    %11 = vector.load %arg7[%c0_13, %c0_14] : memref<32x1xf32, #tpu.memory_space<vmem>>, vector<32x1xf32>
    %12 = vector.broadcast %11 : vector<32x1xf32> to vector<32x8xf32>
    %13 = arith.addf %10, %12 : vector<32x8xf32>
    %cst_15 = arith.constant 0.000000e+00 : f32
    %14 = vector.broadcast %cst_15 : f32 to vector<32x8xf32>
    %15 = arith.maximumf %13, %14 : vector<32x8xf32>
    %c0_16 = arith.constant 0 : index
    %c0_17 = arith.constant 0 : index
    %16 = vector.load %arg8[%c0_16, %c0_17] : memref<32x32xf32, #tpu.memory_space<vmem>>, vector<32x32xf32>
    %cst_18 = arith.constant dense<0.000000e+00> : vector<32x8xf32>
    %17 = tpu.matmul %16, %15, %cst_18 {dimension_numbers = #tpu.dot_dimension_numbers<[1], [0], [0], [1], [0, 0, 1, 1], [], []>} : vector<32x32xf32>, vector<32x8xf32>, vector<32x8xf32> -> vector<32x8xf32>
    %c0_19 = arith.constant 0 : index
    %c0_20 = arith.constant 0 : index
    %18 = vector.load %arg9[%c0_19, %c0_20] : memref<32x1xf32, #tpu.memory_space<vmem>>, vector<32x1xf32>
    %19 = vector.broadcast %18 : vector<32x1xf32> to vector<32x8xf32>
    %20 = arith.addf %17, %19 : vector<32x8xf32>
    %cst_21 = arith.constant 0.000000e+00 : f32
    %21 = vector.broadcast %cst_21 : f32 to vector<32x8xf32>
    %22 = arith.maximumf %20, %21 : vector<32x8xf32>
    %c0_22 = arith.constant 0 : index
    %c0_23 = arith.constant 0 : index
    %23 = vector.load %arg10[%c0_22, %c0_23] : memref<32x1xf32, #tpu.memory_space<vmem>>, vector<32x1xf32>
    %24 = vector.broadcast %23 : vector<32x1xf32> to vector<32x8xf32>
    %25 = arith.mulf %22, %24 : vector<32x8xf32>
    %cst_24 = arith.constant dense<0.000000e+00> : vector<8xf32>
    %26 = vector.multi_reduction <add>, %25, %cst_24 [0] : vector<32x8xf32> to vector<8xf32>
    %27 = vector.shape_cast %26 : vector<8xf32> to vector<1x8xf32>
    %c0_25 = arith.constant 0 : index
    %c0_26 = arith.constant 0 : index
    %28 = vector.load %arg11[%c0_25, %c0_26] : memref<1x1xf32, #tpu.memory_space<vmem>>, vector<1x1xf32>
    %29 = vector.broadcast %28 : vector<1x1xf32> to vector<1x8xf32>
    %30 = arith.addf %27, %29 : vector<1x8xf32>
    %c0_27 = arith.constant 0 : index
    %c0_28 = arith.constant 0 : index
    %31 = vector.load %arg12[%c0_27, %c0_28] : memref<1x8xf32, #tpu.memory_space<vmem>>, vector<1x8xf32>
    tpu.vector_store %arg12[%c0_27, %c0_28], %30 {strides = array<i32>} : memref<1x8xf32, #tpu.memory_space<vmem>>, vector<1x8xf32>,
    return
  }
  func.func @transform_0(%arg0: i32) -> (i32, i32) {
    %c0_i32 = arith.constant 0 : i32
    %c0_i32_0 = arith.constant 0 : i32
    return %c0_i32, %arg0 : i32, i32
  }
  func.func @transform_1(%arg0: i32) -> (i32, i32) {
    %c0_i32 = arith.constant 0 : i32
    %c0_i32_0 = arith.constant 0 : i32
    return %c0_i32, %arg0 : i32, i32
  }
  func.func @transform_2(%arg0: i32) -> (i32, i32) {
    %c0_i32 = arith.constant 0 : i32
    %c0_i32_0 = arith.constant 0 : i32
    return %c0_i32, %arg0 : i32, i32
  }
  func.func @transform_3(%arg0: i32) -> (i32, i32) {
    %c0_i32 = arith.constant 0 : i32
    %c0_i32_0 = arith.constant 0 : i32
    %c0_i32_1 = arith.constant 0 : i32
    return %c0_i32, %c0_i32_0 : i32, i32
  }
  func.func @transform_4(%arg0: i32) -> (i32, i32) {
    %c0_i32 = arith.constant 0 : i32
    %c0_i32_0 = arith.constant 0 : i32
    %c0_i32_1 = arith.constant 0 : i32
    return %c0_i32, %c0_i32_0 : i32, i32
  }
  func.func @transform_5(%arg0: i32) -> (i32, i32) {
    %c0_i32 = arith.constant 0 : i32
    %c0_i32_0 = arith.constant 0 : i32
    %c0_i32_1 = arith.constant 0 : i32
    return %c0_i32, %c0_i32_0 : i32, i32
  }
  func.func @transform_6(%arg0: i32) -> (i32, i32) {
    %c0_i32 = arith.constant 0 : i32
    %c0_i32_0 = arith.constant 0 : i32
    %c0_i32_1 = arith.constant 0 : i32
    return %c0_i32, %c0_i32_0 : i32, i32
  }
  func.func @transform_7(%arg0: i32) -> (i32, i32) {
    %c0_i32 = arith.constant 0 : i32
    %c0_i32_0 = arith.constant 0 : i32
    %c0_i32_1 = arith.constant 0 : i32
    return %c0_i32, %c0_i32_0 : i32, i32
  }
  func.func @transform_8(%arg0: i32) -> (i32, i32) {
    %c0_i32 = arith.constant 0 : i32
    %c0_i32_0 = arith.constant 0 : i32
    %c0_i32_1 = arith.constant 0 : i32
    return %c0_i32, %c0_i32_0 : i32, i32
  }
  func.func @transform_9(%arg0: i32) -> (i32, i32) {
    %c0_i32 = arith.constant 0 : i32
    %c0_i32_0 = arith.constant 0 : i32
    %c0_i32_1 = arith.constant 0 : i32
    return %c0_i32, %c0_i32_0 : i32, i32
  }
  func.func @transform_10(%arg0: i32) -> (i32, i32) {
    %c0_i32 = arith.constant 0 : i32
    %c0_i32_0 = arith.constant 0 : i32
    %c0_i32_1 = arith.constant 0 : i32
    return %c0_i32, %c0_i32_0 : i32, i32
  }
  func.func @transform_11(%arg0: i32) -> (i32, i32) {
    %c0_i32 = arith.constant 0 : i32
    %c0_i32_0 = arith.constant 0 : i32
    return %c0_i32, %arg0 : i32, i32
  }
}

</mosaic_0001>

<bundles_post_ra>
// kernel: tpu_custom_call.1
= control target key start
LH: loop header
LB: loop body
LE: loop exit
PB: predicated region body
PF: predicated region fallthrough
CT: control target
= control target key end

     0   :  { %s907_s0 = inlined_call_operand.vmem [shape: f32[8,8], index: 0, kind: input, shape index: {}]   ;;  %s908_s1 = inlined_call_operand.vmem [shape: f32[4,8], index: 1, kind: input, shape index: {}]   ;;  %s909_s2 = inlined_call_operand.vmem [shape: f32[4,8], index: 2, kind: input, shape index: {}]   ;;  %s910_s3 = inlined_call_operand.vmem [shape: f32[32,8], index: 3, kind: input, shape index: {}]   ;;  %s911_s4 = inlined_call_operand.vmem [shape: f32[32,4], index: 4, kind: input, shape index: {}]   ;;  %s912_s5 = inlined_call_operand.vmem [shape: f32[32,4], index: 5, kind: input, shape index: {}]   ;;  %s913_s6 = inlined_call_operand.vmem [shape: f32[32,1], index: 6, kind: input, shape index: {}]   ;;  %s914_s7 = inlined_call_operand.vmem [shape: f32[32,32], index: 7, kind: input, shape index: {}]   ;;  %s915_s8 = inlined_call_operand.vmem [shape: f32[32,1], index: 8, kind: input, shape index: {}]   ;;  %s916_s9 = inlined_call_operand.vmem [shape: f32[32,1], index: 9, kind: input, shape index: {}]   ;;  %s917_s10 = inlined_call_operand.<no memory space> [shape: f32[1,1], index: 10, kind: input, shape index: {}]   ;;  %s918_s11 = inlined_call_operand.hbm [shape: f32[1,8], index: 11, kind: output, shape index: {}]  }
   0x1   :  { %v16_v0 = vstv %s917_s10 }
   0x2   :  { %17 = vst [vmem:[#allocation2] sm:$0x1] %v16_v0 }
   0x3   :  { %v45_v1 = vld [vmem:[%s907_s0] sm:$0xff]  ;;  %vm153_vm0 = vcmask 64512   ;;  %v42_v3 = vld [vmem:[%s910_s3 + $0x8] sm:$0xff]  ;;  %vm64_vm1 = vcmask 1043456   ;;  %v43_v5 = vld [vmem:[%s910_s3 + $0x10] sm:$0xff]  ;;  %vm51_vm2 = vcmask 31744  }
   0x4   :  { %v41_v2 = vld [vmem:[%s910_s3] sm:$0xff]  ;;  %639 = vmatprep.subr.mxu0 %v45_v1  ;;  %v713_v8 = vmov 0   ;;  %v44_v9 = vld [vmem:[%s910_s3 + $0x18] sm:$0xff]  ;;  %v47_v10 = vld [vmem:[%s911_s4 + $0x8] sm:$0xff] }
   0x5   :  { %641 = vmatprep.mubr.msk.f32.mxu0 %vm153_vm0, %v41_v2  ;;  %v255_v4 = vld [vmem:[%s909_s2] sm:$0xf]  ;;  %640 = vmatpush3.msra.mxu0 %v45_v1  ;;  %v48_v12 = vld [vmem:[%s911_s4 + $0x10] sm:$0xff]  ;;  %v361_v14 = vld [vmem:[%s913_s6 + $0x8] sm:$0xff] }
   0x6   :  { %v50_v6 = vld [vmem:[%s908_s1] sm:$0xf]  ;;  %687 = vset.pattern.permute.xlu0 %v713_v8  ;;  %642 = vmatmul.mubr.msk.f32.vlgmr.msra.gmra.mrb[0].mxu0 %vm153_vm0, %v42_v3  ;;  %v362_v15 = vld [vmem:[%s913_s6 + $0x10] sm:$0xff]  ;;  %v252_v16 = vld [vmem:[%s912_s5 + $0x8] sm:$0xff] }
   0x7   :  { %v46_v7 = vld [vmem:[%s911_s4] sm:$0xff]  ;;  %647 = vmatprep.subr.msk.mxu0 %vm64_vm1, %v255_v4  ;;  %644 = vmatprep.mubr.msk.f32.mxu0 %vm153_vm0, %v43_v5  ;;  %v49_v17 = vld [vmem:[%s911_s4 + $0x18] sm:$0xff]  ;;  %v253_v18 = vld [vmem:[%s912_s5 + $0x10] sm:$0xff] }
   0x8   :  { %648 = vmatpush3.msk.msra.mxu0 %vm64_vm1, %v255_v4  ;;  %631 = vmatprep.subr.msk.mxu1 %vm64_vm1, %v50_v6  ;;  %v251_v11 = vld [vmem:[%s912_s5] sm:$0xff] }
   0x9   :  { %633 = vmatprep.mubr.msk.f32.mxu1 %vm51_vm2, %v46_v7  ;;  %v360_v13 = vld [vmem:[%s913_s6] sm:$0xff]  ;;  %632 = vmatpush3.msk.msra.mxu1 %vm64_vm1, %v50_v6 }
   0xa   :  { %366 = vperm.xlu0 %687, %v360_v13   ;;  %645 = vmatmul.mubr.msk.f32.gmra.mrb[2].mxu0 %vm153_vm0, %v44_v9 }
   0xb   :  { %634 = vmatmul.mubr.msk.f32.vlgmr.msra.gmra.mrb[0].mxu1 %vm51_vm2, %v47_v10  ;;  %649 = vmatprep.mubr.msk.f32.mxu0 %vm51_vm2, %v251_v11 }
   0xc   :  { %636 = vmatprep.mubr.msk.f32.mxu1 %vm51_vm2, %v48_v12  ;;  %688 = vset.pattern.permute.xlu1 %v713_v8 }
   0xd   :  { %18 = vsyncpa [#allocation4], 0  ;;  %376 = vperm.xlu1 %688, %v362_v15   ;;  %v396_v19 = vld [vmem:[%s915_s8] sm:$0xff]  ;;  %v363_v20 = vld [vmem:[%s913_s6 + $0x18] sm:$0xff]  ;;  %vm420_vm3 = vcmask 261120   ;;  %vm574_vm4 = vcmask 57344  }
   0xe   :  { %371 = vperm.xlu0 %687, %v361_v14   ;;  %650 = vmatmul.mubr.msk.f32.vlgmr.msra.gmra.mrb[0].mxu0 %vm51_vm2, %v252_v16  ;;  %v254_v21 = vld [vmem:[%s912_s5 + $0x18] sm:$0xff]  ;;  %v398_v22 = vld [vmem:[%s915_s8 + $0x10] sm:$0xff]  ;;  %v397_v23 = vld [vmem:[%s915_s8 + $0x8] sm:$0xff] }
   0xf   :  { %637 = vmatmul.mubr.msk.f32.gmra.mrb[2].mxu1 %vm51_vm2, %v49_v17  ;;  %652 = vmatprep.mubr.msk.f32.mxu0 %vm51_vm2, %v253_v18  ;;  %v522_v24 = vld [vmem:[%s916_s9] sm:$0xff]  ;;  %v399_v25 = vld [vmem:[%s915_s8 + $0x18] sm:$0xff]  ;;  %v524_v26 = vld [vmem:[%s916_s9 + $0x10] sm:$0xff] }
  0x10   :  { %v523_v27 = vld [vmem:[%s916_s9 + $0x8] sm:$0xff]  ;;  %v563_v28 = vld [vmem:[#allocation2] sm:$0x1]  ;;  %v525_v29 = vld [vmem:[%s916_s9 + $0x18] sm:$0xff] }
  0x11   :  { %381 = vperm.xlu1 %688, %v363_v20   ;;  %v392_v30 = vld [vmem:[%s914_s7] sm:$0xff]  ;;  %v393_v57 = vld [vmem:[%s914_s7 + $0x8] sm:$0xff]  ;;  %v394_v58 = vld [vmem:[%s914_s7 + $0x10] sm:$0xff] }
  0x12   :  { %402 = vperm.xlu0 %687, %v396_v19   ;;  %653 = vmatmul.mubr.msk.f32.gmra.mrb[2].mxu0 %vm51_vm2, %v254_v21  ;;  %v395_v59 = vld [vmem:[%s914_s7 + $0x18] sm:$0xff]  ;;  %s714_s7 = smov [#allocation3]  }
  0x13   :  { %663 = vmatprep.mubr.msk.f32.mxu1 %vm420_vm3, %v392_v30  ;;  %s582_s27 = sshll.u32 %s714_s7, 4  ;;  %s583_s27 = int_to_ptr.vmem [resolvable:$true] %s582_s27 }
  0x14   :  { %s689_s0 = scalar_lea.vmem %s583_s27, 16  ;;  %s693_s28 = scalar_lea.vmem %s583_s27, 32 }
  0x15   :  { %407 = vperm.xlu1 %688, %v397_v23   ;;  %p690_p0 = scmp.ne.s32.totalorder %s583_s27, %s689_s0  ;;  %p694_p1 = scmp.lt.s32.totalorder %s583_s27, %s583_s27 }
  0x16   :  { %412 = vperm.xlu0 %687, %v398_v22   ;;  %p695_p2 = scmp.lt.s32.totalorder %s693_s28, %s689_s0 }
  0x18   :  { %p696_p3 = por %p695_p2, %p694_p1 }
  0x19   :  { %417 = vperm.xlu1 %688, %v399_v25  }
  0x1a   :  { %528 = vperm.xlu0 %687, %v522_v24   ;;  %p697_p4 = pnand %p696_p3, %p690_p0 }
  0x1d   :  { %533 = vperm.xlu1 %688, %v523_v27  }
  0x1e   :  { %538 = vperm.xlu0 %687, %v524_v26   ;;  %v569_v26 = vlaneseq }
  0x21   :  { %543 = vperm.xlu1 %688, %v525_v29   ;;  %v570_v29 = vshrl.u32 %v569_v26, 7 }
  0x22   :  { %566 = vperm.xlu0 %687, %v563_v28  }
  0x89   :  { %v367_v31 = vpop.permute.xlu0 %366 }
  0x8c   :  { %v377_v34 = vpop.permute.xlu1 %376 }
  0x8d   :  { %v372_v40 = vpop.permute.xlu0 %371 }
  0x90   :  { %v382_v48 = vpop.permute.xlu1 %381 }
  0x91   :  { %v403_v60 = vpop.permute.xlu0 %402 }
  0x94   :  { %v408_v61 = vpop.permute.xlu1 %407 }
  0x95   :  { %v413_v62 = vpop.permute.xlu0 %412 }
  0x98   :  { %v418_v63 = vpop.permute.xlu1 %417 }
  0x99   :  { %v529_v4 = vpop.permute.xlu0 %528 }
  0x9c   :  { %v534_v5 = vpop.permute.xlu1 %533 }
  0x9d   :  { %v539_v18 = vpop.permute.xlu0 %538 }
  0xa0   :  { %v544_v19 = vpop.permute.xlu1 %543 }
  0xde   :  { %v635_v32 = vpop.f32.mrb[0].mxu1 }
  0xdf   :  { %v134_v33 = vpop.f32.mrb[1].mxu1 }
  0xe1   :  { %v651_v35 = vpop.f32.mrb[0].mxu0 }
  0xe2   :  { %v638_v36 = vpop.f32.mrb[2].mxu1  ;;  %v677_v37 = vadd.f32 %v651_v35, %v635_v32  ;;  %v337_v38 = vpop.f32.mrb[1].mxu0  ;;  %v571_v32 = vsub.s32 0, %v570_v29 }
  0xe3   :  { %v144_v39 = vpop.f32.mrb[3].mxu1  ;;  %v678_v41 = vadd.f32 %v337_v38, %v134_v33 }
  0xe4   :  { %v385_v42 = vadd.f32 %v677_v37, %v372_v40 }
  0xe5   :  { %v384_v43 = vadd.f32 %v678_v41, %v367_v31  ;;  %v654_v44 = vpop.f32.mrb[2].mxu0 }
  0xe6   :  { %v389_v45 = vmax.f32 %v385_v42, 0.0  ;;  %v679_v46 = vadd.f32 %v654_v44, %v638_v36  ;;  %v347_v47 = vpop.f32.mrb[3].mxu0 }
  0xe7   :  { %v388_v49 = vmax.f32 %v384_v43, 0.0  ;;  %v680_v50 = vadd.f32 %v347_v47, %v144_v39 }
  0xe8   :  { %v387_v51 = vadd.f32 %v679_v46, %v382_v48 }
  0xe9   :  { %v386_v52 = vadd.f32 %v680_v50, %v377_v34  ;;  %v669_v53 = vpack.c.bf16 %v389_v45, %v388_v49  ;;  %v567_v34 = vpop.permute.xlu0 %566 }
  0xea   :  { %v391_v54 = vmax.f32 %v387_v51, 0.0  ;;  %v572_v36 = vrot.slane %v567_v34, %v571_v32 }
  0xeb   :  { %v390_v55 = vmax.f32 %v386_v52, 0.0  ;;  %670 = vmatprep.subr.bf16.mxu1 %v669_v53 }
  0xec   :  { %672 = vmatpush3.bf16.msra.mxu1 %v669_v53 }
  0xed   :  { %v673_v56 = vpack.c.bf16 %v391_v54, %v390_v55 }
  0xef   :  { %674 = vmatprep.subr.bf16.mxu1 %v673_v56 }
  0xf0   :  { %676 = vmatpush3.bf16.msra.mxu1 %v673_v56 }
  0xf3   :  { %664 = vmatmul.mubr.msk.f32.vlgmr.msra.gmra.mrb[4].mxu1 %vm420_vm3, %v393_v57 }
  0xf4   :  { %666 = vmatprep.mubr.msk.f32.mxu1 %vm420_vm3, %v394_v58 }
  0xf7   :  { %667 = vmatmul.mubr.msk.f32.gmra.mrb[6].mxu1 %vm420_vm3, %v395_v59 }
 0x1c6   :  { %v665_v0 = vpop.f32.mrb[4].mxu1 }
 0x1c7   :  { %v505_v1 = vadd.f32 %v665_v0, %v408_v61  ;;  %v499_v2 = vpop.f32.mrb[5].mxu1 }
 0x1c8   :  { %v500_v3 = vadd.f32 %v499_v2, %v403_v60 }
 0x1c9   :  { %v519_v6 = vmax.f32 %v505_v1, 0.0 }
 0x1ca   :  { %v518_v7 = vmax.f32 %v500_v3, 0.0  ;;  %v668_v8 = vpop.f32.mrb[6].mxu1 }
 0x1cb   :  { %v547_v9 = vmul.f32 %v534_v5, %v519_v6  ;;  %v515_v10 = vadd.f32 %v668_v8, %v418_v63  ;;  %v509_v11 = vpop.f32.mrb[7].mxu1 }
 0x1cc   :  { %v546_v12 = vmul.f32 %v529_v4, %v518_v7  ;;  %v510_v13 = vadd.f32 %v509_v11, %v413_v62 }
 0x1cd   :  { %v551_v14 = vsel %vm153_vm0, %v547_v9, 0.0  ;;  %v521_v15 = vmax.f32 %v515_v10, 0.0 }
 0x1ce   :  { %v550_v16 = vsel %vm153_vm0, %v546_v12, 0.0  ;;  %v520_v17 = vmax.f32 %v510_v13, 0.0 }
 0x1cf   :  { %v552_v20 = vadd.f32 %v551_v14, %v550_v16  ;;  %v549_v21 = vmul.f32 %v544_v19, %v521_v15 }
 0x1d0   :  { %v548_v22 = vmul.f32 %v539_v18, %v520_v17 }
 0x1d1   :  { %v555_v25 = vsel %vm153_vm0, %v549_v21, 0.0 }
 0x1d2   :  { %v553_v23 = vsel %vm153_vm0, %v548_v22, 0.0 }
 0x1d3   :  { %v554_v24 = vadd.f32 %v553_v23, %v552_v20 }
 0x1d5   :  { %v556_v27 = vadd.f32 %v555_v25, %v554_v24 }
 0x1d7   :  { %v557_v28 = vrot.slane %v556_v27, 4 }
 0x1d9   :  { %v558_v30 = vadd.f32 %v557_v28, %v556_v27 }
 0x1db   :  { %v559_v31 = vrot.slane %v558_v30, 2 }
 0x1dd   :  { %v560_v33 = vadd.f32 %v559_v31, %v558_v30 }
 0x1df   :  { %v561_v35 = vrot.slane %v560_v33, 1 }
 0x1e1   :  { %v562_v37 = vadd.f32 %v561_v35, %v560_v33 }
 0x1e3   :  { %v573_v38 = vadd.f32 %v572_v36, %v562_v37 }
 0x1e5   :  { %575 = vst.msk [vmem:[#allocation3] sm:$0x1] %vm574_vm4, %v573_v38 }
 0x1e6   :  { %700 = shalt.err (!%p697_p4)
}
 0x1e7   :  { %s701_s4 = scalar_lea.hbm %s918_s11, 16 }
 0x1e8   :  { %p702_p5 = scmp.ne.s32.totalorder %s918_s11, %s701_s4  ;;  %p705_p6 = scmp.lt.u32.totalorder %s701_s4, %s918_s11 }
 0x1ea   :  { %p707_p7 = pnand %p705_p6, %p702_p5 }
 0x1ec   :  { %710 = shalt.err (!%p707_p7)
}
 0x1ed   :  { %585 = dma.vmem_to_hbm [thread:$0]  %s583_s27, 16, %s918_s11, [#allocation4]  }
 0x1ee   :  { %711 = dma.done.wait [#allocation4], 16  }
 0x1ef   :  { %712 = vsyncadd [#allocation4], 4294967280 }
 0x1f0   :  { %589 = vsyncpa [#allocation4], 1 }

</bundles_post_ra>
